<compile_context>
chip_gen: v7x
topology: tpu7x:2x2x1
jax: 0.10.0
libtpu: 0.0.40
codegen_flags: <defaults>
</compile_context>

<pallas_src>
import functools
import math

import jax
import jax.numpy as jnp
from jax.experimental import pallas as pl
from jax.experimental.pallas import tpu as pltpu


# Well under v7x's 64 MiB physical VMEM; actual per-step usage is ~9 MiB (linear)
# and <2 MiB (flash SDPA), so this is headroom, not pressure.
_VMEM_LIMIT = 32 * 1024 * 1024

# Finite "minus infinity" for structural (causal) masking: exp underflows to 0 in f32.
_MASK_VALUE = -1e30


def _pick_tile(dim, target, granule):
    """Largest divisor of `dim` that is <= target and a multiple of `granule`.

    Falls back to the full dimension (always layout-legal) only when no such
    divisor exists.
    TODO(synk): true fix for pathological (prime-ish) dims is padding / masked
    tail blocks rather than a full-dim block.
    """
    if dim <= target:
        return dim
    cand = (min(target, dim) // granule) * granule
    while cand >= granule:
        if dim % cand == 0:
            return cand
        cand -= granule
    return dim


# ---------------------------------------------------------------------------
# Kernel 1: tiled dense linear layer  (x @ W + b)  — QKV proj and out proj
# ---------------------------------------------------------------------------
def _linear_kernel(compute_dtype, x_ref, w_ref, b_ref, o_ref, acc_ref):
    k = pl.program_id(2)

    @pl.when(k == 0)
    def _init():
        acc_ref[...] = jnp.zeros_like(acc_ref)

    # bf16 MXU operands, f32 accumulation.
    acc_ref[...] += jnp.dot(x_ref[...].astype(compute_dtype),
                            w_ref[...].astype(compute_dtype),
                            preferred_element_type=jnp.float32)

    @pl.when(k == pl.num_programs(2) - 1)
    def _store():
        o_ref[...] = (acc_ref[...] + b_ref[...].astype(jnp.float32)).astype(o_ref.dtype)


def linear(x2d, w, b, *, tm=512, tn=512, tk=512, compute_dtype=jnp.bfloat16):
    """x2d: (M, K), w: (K, N), b: (1, N) -> (M, N). Tiled with K-accumulation."""
    M, K = x2d.shape
    Kw, N = w.shape
    assert K == Kw and b.shape == (1, N)
    tm = _pick_tile(M, tm, 8)     # sublane granule
    tn = _pick_tile(N, tn, 128)   # lane granule (keeps output stores unmasked)
    tk = _pick_tile(K, tk, 128)   # lane granule for the x tile's minor dim
    grid = (M // tm, N // tn, K // tk)
    return pl.pallas_call(
        functools.partial(_linear_kernel, compute_dtype),
        out_shape=jax.ShapeDtypeStruct((M, N), x2d.dtype),
        grid=grid,
        in_specs=[
            pl.BlockSpec((tm, tk), lambda i, j, k: (i, k)),
            pl.BlockSpec((tk, tn), lambda i, j, k: (k, j)),
            pl.BlockSpec((1, tn), lambda i, j, k: (0, j)),
        ],
        out_specs=pl.BlockSpec((tm, tn), lambda i, j, k: (i, j)),
        scratch_shapes=[pltpu.VMEM((tm, tn), jnp.float32)],
        compiler_params=pltpu.CompilerParams(
            dimension_semantics=("parallel", "parallel", "arbitrary"),
            vmem_limit_bytes=_VMEM_LIMIT),
    )(x2d, w, b)


# ---------------------------------------------------------------------------
# Kernel 2: flash (online-softmax) scaled dot-product attention
#   grid = (B, H, Sq // Tq, Skv // Tkv), KV axis innermost / "arbitrary"
# ---------------------------------------------------------------------------
def _flash_sdpa_kernel(scale, causal, has_mask, compute_dtype, *refs):
    if has_mask:
        q_ref, k_ref, v_ref, mask_ref = refs[:4]
        o_ref, m_sc, l_sc, acc_sc = refs[4:]
    else:
        q_ref, k_ref, v_ref = refs[:3]
        mask_ref = None
        o_ref, m_sc, l_sc, acc_sc = refs[3:]

    ki = pl.program_id(3)

    @pl.when(ki == 0)
    def _init():
        m_sc[...] = jnp.full(m_sc.shape, -jnp.inf, dtype=m_sc.dtype)
        l_sc[...] = jnp.zeros_like(l_sc)
        acc_sc[...] = jnp.zeros_like(acc_sc)

    q = q_ref[0, 0]                       # (Tq, Dh)
    k = k_ref[0, 0]                       # (Tkv, Dh)
    v = v_ref[0, 0]                       # (Tkv, Dh)
    tq, _ = q.shape
    tkv = k.shape[0]

    # Reference: matmul(q, k^T / sqrt(d_k)) — scale k before the contraction.
    # bf16 MXU operands, f32 accumulation; no materialized transpose.
    s = jax.lax.dot_general(
        q.astype(compute_dtype), (k * scale).astype(compute_dtype),
        dimension_numbers=(((1,), (1,)), ((), ())),
        preferred_element_type=jnp.float32)            # (Tq, Tkv) f32

    if mask_ref is not None:
        s = s + mask_ref[...].astype(jnp.float32)      # additive mask (reference)

    allowed = None
    if causal:
        row = pl.program_id(2) * tq + jax.lax.broadcasted_iota(jnp.int32, (tq, tkv), 0)
        col = ki * tkv + jax.lax.broadcasted_iota(jnp.int32, (tq, tkv), 1)
        allowed = col <= row
        s = jnp.where(allowed, s, _MASK_VALUE)

    # --- online softmax update ---
    m_prev = m_sc[...]                                 # (Tq, 1) f32
    m_new = jnp.maximum(m_prev, jnp.max(s, axis=-1, keepdims=True))
    alpha = jnp.exp(m_prev - m_new)                    # (Tq, 1) f32
    # exp on compute-dtype inputs (bf16 EUP on v6e/v7x; range bounded post max-sub).
    # TODO(synk): on v5e (no bf16 EUP) pass compute_dtype=float32 for the exp path.
    p = jnp.exp((s - m_new).astype(compute_dtype))     # (Tq, Tkv)
    if causal:
        # Zero out masked probs: also makes fully-masked (future) KV blocks inert.
        p = jnp.where(allowed, p, jnp.zeros_like(p))

    l_sc[...] = alpha * l_sc[...] + p.astype(jnp.float32).sum(axis=-1, keepdims=True)
    acc_sc[...] = alpha * acc_sc[...] + jax.lax.dot_general(
        p, v.astype(compute_dtype),
        dimension_numbers=(((1,), (0,)), ((), ())),
        preferred_element_type=jnp.float32)            # (Tq, Dh) f32
    m_sc[...] = m_new

    @pl.when(ki == pl.num_programs(3) - 1)
    def _finalize():
        inv_l = pl.reciprocal(l_sc[...], approx=True)  # EUP vrcp — ~free
        # TODO(synk): with Dh < 128 this store is lane-masked; a (B,H,S*Dh) output
        # slab would be lane-dense but the in-kernel (Tq,Dh)->(Tq*Dh,) reshape would
        # relayout — output traffic is small, so keep the simple layout.
        o_ref[0, 0] = (acc_sc[...] * inv_l).astype(o_ref.dtype)


def flash_scaled_dot_product(q, k, v, mask=None, causal=False, *,
                             block_q=256, block_kv=256,
                             compute_dtype=jnp.bfloat16):
    """q, k, v: (B, H, S, Dh).  mask: (S, S) additive float mask or None.
    causal=True builds the causal mask in-kernel (no HBM mask traffic)."""
    B, H, S, Dh = q.shape
    scale = 1.0 / math.sqrt(Dh)
    has_mask = mask is not None

    tq = _pick_tile(S, block_q, 8)
    # The (Tq, Tkv) mask block puts Tkv in the lane dim -> needs 128 granularity.
    tkv = _pick_tile(S, block_kv, 128 if has_mask else 8)
    grid = (B, H, S // tq, S // tkv)

    q_spec = pl.BlockSpec((1, 1, tq, Dh), lambda b, h, qi, ki: (b, h, qi, 0))
    kv_spec = pl.BlockSpec((1, 1, tkv, Dh), lambda b, h, qi, ki: (b, h, ki, 0))
    in_specs = [q_spec, kv_spec, kv_spec]
    args = [q, k, v]
    if has_mask:
        assert mask.shape == (S, S), "additive mask must be (S, S)"
        in_specs.append(pl.BlockSpec((tq, tkv), lambda b, h, qi, ki: (qi, ki)))
        args.append(mask.astype(compute_dtype))   # store mask narrow, upcast in-kernel

    kernel = functools.partial(_flash_sdpa_kernel, scale, causal, has_mask,
                               compute_dtype)

    return pl.pallas_call(
        kernel,
        out_shape=jax.ShapeDtypeStruct((B, H, S, Dh), q.dtype),
        grid=grid,
        in_specs=in_specs,
        out_specs=pl.BlockSpec((1, 1, tq, Dh), lambda b, h, qi, ki: (b, h, qi, 0)),
        scratch_shapes=[pltpu.VMEM((tq, 1), jnp.float32),    # running max m
                        pltpu.VMEM((tq, 1), jnp.float32),    # running denom l
                        pltpu.VMEM((tq, Dh), jnp.float32)],  # output accumulator
        compiler_params=pltpu.CompilerParams(
            dimension_semantics=("parallel", "parallel", "parallel", "arbitrary"),
            vmem_limit_bytes=_VMEM_LIMIT),
    )(*args)


# ---------------------------------------------------------------------------
# Module-equivalent forward
# ---------------------------------------------------------------------------
def multi_head_attention(x, params, num_heads, mask=None, causal=False,
                         compute_dtype=jnp.bfloat16):
    B, S, D = x.shape
    Dh = D // num_heads

    # qkv = self.qkv_layer(x)
    qkv = linear(x.reshape(B * S, D), params["w_qkv"], params["b_qkv"],
                 compute_dtype=compute_dtype)                             # (B*S, 3D)

    # reshape -> (B,S,H,3,Dh), bring heads forward, split q/k/v (matches the
    # reshape/permute/chunk in the reference).
    # TODO(synk): folding this head split into the SDPA index_maps (per the review)
    # needs a singleton block on the second-to-minor "3"/"H" axis, which violates the
    # (8,128) block-shape rule; keeping it as one XLA transpose pass instead.
    qkv = qkv.reshape(B, S, num_heads, 3, Dh)
    qkv = jnp.transpose(qkv, (3, 0, 2, 1, 4))                             # (3,B,H,S,Dh)
    q, k, v = qkv[0], qkv[1], qkv[2]

    # TODO(synk): the flash kernel never materializes the (B,H,S,S) attention probs
    # (the reference forward never uses them); a separate non-flash path emitting them
    # in bf16 could be added if they are ever needed.
    values = flash_scaled_dot_product(q, k, v, mask=mask, causal=causal,
                                      compute_dtype=compute_dtype)        # (B,H,S,Dh)

    # Reference quirk: (B,H,S,Dh) -> (B,S,H*Dh) with NO transpose back.
    values = values.reshape(B, S, num_heads * Dh)

    # out = self.linear_layer(values)
    out = linear(values.reshape(B * S, D), params["w_out"], params["b_out"],
                 compute_dtype=compute_dtype).reshape(B, S, D)
    return out


def init_params(key, d_model):
    k1, k2, k3, k4 = jax.random.split(key, 4)
    scale = 1.0 / math.sqrt(d_model)
    return {
        # stored as (in, out), i.e. transposed relative to nn.Linear.weight
        "w_qkv": jax.random.uniform(k1, (d_model, 3 * d_model), jnp.float32, -scale, scale),
        "b_qkv": jax.random.uniform(k2, (1, 3 * d_model), jnp.float32, -scale, scale),
        "w_out": jax.random.uniform(k3, (d_model, d_model), jnp.float32, -scale, scale),
        "b_out": jax.random.uniform(k4, (1, d_model), jnp.float32, -scale, scale),
    }


if __name__ == "__main__":
    batch, seq, d_model, num_heads = 2, 8, 32, 4

    key = jax.random.PRNGKey(0)
    kx, kp = jax.random.split(key)
    x = jax.random.normal(kx, (batch, seq, d_model), dtype=jnp.float32)
    params = init_params(kp, d_model)

    # pure-JAX f32 reference (shares the intentionally quirky reshape of the spec)
    def ref_forward(xin, mask=None):
        B, S, D = xin.shape
        Dh = D // num_heads
        qkv = xin.reshape(B * S, D) @ params["w_qkv"] + params["b_qkv"]
        qkv = qkv.reshape(B, S, num_heads, 3 * Dh).transpose(0, 2, 1, 3)
        q, k, v = jnp.split(qkv, 3, axis=-1)
        s = jnp.einsum("bhqd,bhkd->bhqk", q, k / math.sqrt(Dh))
        if mask is not None:
            s = s + mask
        a = jax.nn.softmax(s, axis=-1)
        vals = jnp.einsum("bhqk,bhkd->bhqd", a, v).reshape(B, S, D)
        out = vals.reshape(B * S, D) @ params["w_out"] + params["b_out"]
        return out.reshape(B, S, D)

    # 1) default fast path: no mask
    out = multi_head_attention(x, params, num_heads)
    out = jax.block_until_ready(out)
    assert out.shape == (batch, seq, d_model)

    # 2) structurally-causal path: mask synthesized in-kernel (no (S,S) HBM mask)
    out_causal = multi_head_attention(x, params, num_heads, causal=True)
    out_causal = jax.block_until_ready(out_causal)

    # 3) explicit additive-mask path (same causal mask, DMA'd per block)
    causal_mask = jnp.where(jnp.tril(jnp.ones((seq, seq), dtype=bool)),
                            0.0, -1e9).astype(jnp.float32)
    out_masked = multi_head_attention(x, params, num_heads, mask=causal_mask)
    out_masked = jax.block_until_ready(out_masked)
    assert out_causal.shape == (batch, seq, d_model)
    assert out_masked.shape == (batch, seq, d_model)

    ref_out = ref_forward(x, None)
    ref_out_m = ref_forward(x, causal_mask)

    # bf16 MXU operands + approx reciprocal vs a pure-f32 reference -> loosened tol.
    tol = dict(atol=2e-2, rtol=2e-2)
    assert jnp.allclose(out, ref_out, **tol), "no-mask output mismatch"
    assert jnp.allclose(out_causal, ref_out_m, **tol), "in-kernel-causal output mismatch"
    assert jnp.allclose(out_masked, ref_out_m, **tol), "explicit-mask output mismatch"

    print("KERNEL_OK")
</pallas_src>

<mosaic_0001>
module attributes {stable_mosaic.version = 11 : i64} {
  func.func @_linear_kernel(%arg0: i32, %arg1: i32, %arg2: i32, %arg3: memref<16x32xf32, #tpu.memory_space<vmem>>, %arg4: memref<32x96xf32, #tpu.memory_space<vmem>>, %arg5: memref<1x96xf32, #tpu.memory_space<vmem>>, %arg6: memref<16x96xf32, #tpu.memory_space<vmem>>, %arg7: memref<16x96xf32, #tpu.memory_space<vmem>>) attributes {dimension_semantics = [#tpu.dimension_semantics<parallel>, #tpu.dimension_semantics<parallel>, #tpu.dimension_semantics<arbitrary>], iteration_bounds = array<i64: 1, 1, 1>, scalar_prefetch = 0 : i64, scratch_operands = 1 : i64, tpu.core_type = #tpu.core_type<tc>, window_params = [{transform_indices = @transform_0, window_bounds = array<i64: 16, 32>}, {transform_indices = @transform_1, window_bounds = array<i64: 32, 96>}, {transform_indices = @transform_2, window_bounds = array<i64: 1, 96>}, {transform_indices = @transform_3, window_bounds = array<i64: 16, 96>}]} {
    %c0_i32 = arith.constant 0 : i32
    %0 = arith.cmpi eq, %arg2, %c0_i32 : i32
    %1 = arith.extui %0 : i1 to i32
    %c0_i32_0 = arith.constant 0 : i32
    %2 = arith.cmpi ne, %1, %c0_i32_0 : i32
    scf.if %2 {
      %cst_10 = arith.constant 0.000000e+00 : f32
      %14 = vector.broadcast %cst_10 : f32 to vector<16x96xf32>
      %c0_11 = arith.constant 0 : index
      %c0_12 = arith.constant 0 : index
      %15 = vector.load %arg7[%c0_11, %c0_12] : memref<16x96xf32, #tpu.memory_space<vmem>>, vector<16x96xf32>
      tpu.vector_store %arg7[%c0_11, %c0_12], %14 {strides = array<i32>} : memref<16x96xf32, #tpu.memory_space<vmem>>, vector<16x96xf32>,
    } else {
    }
    %c0 = arith.constant 0 : index
    %c0_1 = arith.constant 0 : index
    %3 = vector.load %arg7[%c0, %c0_1] : memref<16x96xf32, #tpu.memory_space<vmem>>, vector<16x96xf32>
    %c0_2 = arith.constant 0 : index
    %c0_3 = arith.constant 0 : index
    %4 = vector.load %arg3[%c0_2, %c0_3] : memref<16x32xf32, #tpu.memory_space<vmem>>, vector<16x32xf32>
    %5 = arith.truncf %4 : vector<16x32xf32> to vector<16x32xbf16>
    %c0_4 = arith.constant 0 : index
    %c0_5 = arith.constant 0 : index
    %6 = vector.load %arg4[%c0_4, %c0_5] : memref<32x96xf32, #tpu.memory_space<vmem>>, vector<32x96xf32>
    %7 = arith.truncf %6 : vector<32x96xf32> to vector<32x96xbf16>
    %cst = arith.constant dense<0.000000e+00> : vector<16x96xf32>
    %8 = tpu.matmul %5, %7, %cst {dimension_numbers = #tpu.dot_dimension_numbers<[1], [0], [0], [1], [0, 0, 1, 1], [], []>} : vector<16x32xbf16>, vector<32x96xbf16>, vector<16x96xf32> -> vector<16x96xf32>
    %9 = arith.addf %3, %8 : vector<16x96xf32>
    %c0_6 = arith.constant 0 : index
    %c0_7 = arith.constant 0 : index
    %10 = vector.load %arg7[%c0_6, %c0_7] : memref<16x96xf32, #tpu.memory_space<vmem>>, vector<16x96xf32>
    tpu.vector_store %arg7[%c0_6, %c0_7], %9 {strides = array<i32>} : memref<16x96xf32, #tpu.memory_space<vmem>>, vector<16x96xf32>,
    %c0_i32_8 = arith.constant 0 : i32
    %11 = arith.cmpi eq, %arg2, %c0_i32_8 : i32
    %12 = arith.extui %11 : i1 to i32
    %c0_i32_9 = arith.constant 0 : i32
    %13 = arith.cmpi ne, %12, %c0_i32_9 : i32
    scf.if %13 {
      %c0_10 = arith.constant 0 : index
      %c0_11 = arith.constant 0 : index
      %14 = vector.load %arg7[%c0_10, %c0_11] : memref<16x96xf32, #tpu.memory_space<vmem>>, vector<16x96xf32>
      %c0_12 = arith.constant 0 : index
      %c0_13 = arith.constant 0 : index
      %15 = vector.load %arg5[%c0_12, %c0_13] : memref<1x96xf32, #tpu.memory_space<vmem>>, vector<1x96xf32>
      %16 = vector.broadcast %15 : vector<1x96xf32> to vector<16x96xf32>
      %17 = arith.addf %14, %16 : vector<16x96xf32>
      %c0_14 = arith.constant 0 : index
      %c0_15 = arith.constant 0 : index
      %18 = vector.load %arg6[%c0_14, %c0_15] : memref<16x96xf32, #tpu.memory_space<vmem>>, vector<16x96xf32>
      tpu.vector_store %arg6[%c0_14, %c0_15], %17 {strides = array<i32>} : memref<16x96xf32, #tpu.memory_space<vmem>>, vector<16x96xf32>,
    } else {
    }
    return
  }
  func.func @transform_0(%arg0: i32, %arg1: i32, %arg2: i32) -> (i32, i32) {
    %c0_i32 = arith.constant 0 : i32
    return %arg0, %arg2 : i32, i32
  }
  func.func @transform_1(%arg0: i32, %arg1: i32, %arg2: i32) -> (i32, i32) {
    %c0_i32 = arith.constant 0 : i32
    return %arg2, %arg1 : i32, i32
  }
  func.func @transform_2(%arg0: i32, %arg1: i32, %arg2: i32) -> (i32, i32) {
    %c0_i32 = arith.constant 0 : i32
    %c0_i32_0 = arith.constant 0 : i32
    return %c0_i32, %arg1 : i32, i32
  }
  func.func @transform_3(%arg0: i32, %arg1: i32, %arg2: i32) -> (i32, i32) {
    %c0_i32 = arith.constant 0 : i32
    return %arg0, %arg1 : i32, i32
  }
}

</mosaic_0001>

<bundles_post_ra>
// kernel: tpu_custom_call.1
= control target key start
LH: loop header
LB: loop body
LE: loop exit
PB: predicated region body
PF: predicated region fallthrough
CT: control target
= control target key end

     0   :  { %8 = vsyncpa [#allocation4], 0  ;;  %s319_s0 = inlined_call_operand.hbm [shape: f32[16,32], index: 0, kind: input, shape index: {}]   ;;  %s320_s1 = inlined_call_operand.hbm [shape: f32[32,96], index: 1, kind: input, shape index: {}]   ;;  %s321_s2 = inlined_call_operand.vmem [shape: f32[1,96], index: 2, kind: input, shape index: {}]   ;;  %s322_s3 = inlined_call_operand.hbm [shape: f32[16,96], index: 3, kind: output, shape index: {}]  }
   0x1   :  { %9 = vsyncpa [#allocation7], 0 }
   0x2   :  { %10 = vsyncpa [#allocation5], 0  ;;  %s238_s12 = smov [#allocation3]   ;;  %s166_s16 = scalar_lea.hbm %s319_s0, 256 }
   0x3   :  { %s16_s13 = sshll.u32 %s238_s12, 4  ;;  %p167_p0 = scmp.ne.s32.totalorder %s319_s0, %s166_s16  ;;  %s17_s13 = int_to_ptr.vmem [resolvable:$true] %s16_s13 }
   0x4   :  { %p170_p1 = scmp.lt.u32.totalorder %s166_s16, %s319_s0 }
   0x6   :  { %p172_p2 = pnand %p170_p1, %p167_p0 }
   0x8   :  { %175 = shalt.err (!%p172_p2)
}
   0x9   :  { %s176_s21 = scalar_lea.vmem %s17_s13, 256  ;;  %p181_p4 = scmp.lt.s32.totalorder %s17_s13, %s17_s13 }
   0xa   :  { %p177_p3 = scmp.ne.s32.totalorder %s17_s13, %s176_s21  ;;  %p182_p5 = scmp.lt.s32.totalorder %s176_s21, %s176_s21 }
   0xc   :  { %p183_p6 = por %p182_p5, %p181_p4 }
   0xe   :  { %p184_p7 = pnand %p183_p6, %p177_p3 }
  0x10   :  { %187 = shalt.err (!%p184_p7)
}
  0x11   :  { %s239_s22 = smov 128   ;;  %s240_s23 = smov 8  }
  0x12   :  { %22 = dma.hbm_to_vmem [thread:$0]  %s319_s0, 256, %s17_s13, [#allocation4], %s239_s22, %s239_s22, %s240_s23  }
  0x13   :  { %s241_s26 = smov [#allocation6]   ;;  %s188_s30 = scalar_lea.hbm %s320_s1, 512 }
  0x14   :  { %s28_s27 = sshll.u32 %s241_s26, 4  ;;  %p189_p8 = scmp.ne.s32.totalorder %s320_s1, %s188_s30  ;;  %s29_s27 = int_to_ptr.vmem [resolvable:$true] %s28_s27 }
  0x15   :  { %p192_p9 = scmp.lt.u32.totalorder %s188_s30, %s320_s1 }
  0x17   :  { %p194_p10 = pnand %p192_p9, %p189_p8 }
  0x19   :  { %197 = shalt.err (!%p194_p10)
}
  0x1a   :  { %s198_s8 = scalar_lea.vmem %s29_s27, 512  ;;  %p203_p12 = scmp.lt.s32.totalorder %s29_s27, %s29_s27 }
  0x1b   :  { %p199_p11 = scmp.ne.s32.totalorder %s29_s27, %s198_s8  ;;  %p204_p13 = scmp.lt.s32.totalorder %s198_s8, %s198_s8 }
  0x1d   :  { %p205_p0 = por %p204_p13, %p203_p12 }
  0x1f   :  { %p206_p1 = pnand %p205_p0, %p199_p11 }
  0x21   :  { %209 = shalt.err (!%p206_p1)
}
  0x22   :  { %34 = dma.hbm_to_vmem [thread:$0]  %s320_s1, 512, %s29_s27, [#allocation7], %s239_s22, %s239_s22, %s240_s23  }
  0x23   :  { %232 = dma.done.wait [#allocation4], 256  }
  0x24   :  { %233 = vsyncadd [#allocation4], 4294967040 }
  0x25   :  { %234 = dma.done.wait [#allocation7], 512  }
  0x26   :  { %235 = vsyncadd [#allocation7], 4294966784  ;;  %vm48_vm0 = vcmask 785408   ;;  %v242_v0 = vmov 0.0   ;;  %vm243_vm1 = vmmov 0   ;;  %v56_v1 = vld [vmem:[#allocation6] sm:$0xff] }
  0x27   :  { %49 = vst.msk [vmem:[#allocation2] sm:$0xff] %vm48_vm0, %v242_v0  ;;  %50 = vst.msk [vmem:[#allocation2 + $0x8] sm:$0xff] %vm48_vm0, %v242_v0  ;;  %151 = vmatprep.subr.bf16.mxu0 %v242_v0  ;;  %155 = vmatprep.mubr.msk.bf16.mxu0 %vm243_vm1, %v242_v0  ;;  %v57_v2 = vld [vmem:[#allocation6 + $0x8] sm:$0xff]  ;;  %v58_v3 = vld [vmem:[#allocation6 + $0x10] sm:$0xff]  ;;  %vm62_vm2 = vcmask 261120   ;;  %s244_s11 = smov [#allocation8]  }
  0x28   :  { %v60_v4 = vpack.c.bf16 %v57_v2, %v56_v1  ;;  %v59_v5 = vld [vmem:[#allocation6 + $0x18] sm:$0xff]  ;;  %v53_v7 = vld [vmem:[#allocation3] sm:$0xff]  ;;  %v147_v18 = vld [vmem:[%s321_s2] ss:$0 sm:$0xff]  ;;  %s133_s12 = sshll.u32 %s244_s11, 4  ;;  %s134_s12 = int_to_ptr.vmem [resolvable:$true] %s133_s12 }
  0x29   :  { %v61_v6 = vpack.c.bf16 %v59_v5, %v58_v3  ;;  %v54_v8 = vld [vmem:[#allocation3 + $0x8] sm:$0xff]  ;;  %s210_s13 = scalar_lea.vmem %s134_s12, 256  ;;  %p215_p3 = scmp.lt.s32.totalorder %s134_s12, %s134_s12 }
  0x2a   :  { %152 = vmatpush3.bf16.msra.mxu0 %v60_v4  ;;  %v55_v9 = vpack.c.bf16 %v54_v8, %v53_v7  ;;  %p211_p2 = scmp.ne.s32.totalorder %s134_s12, %s210_s13  ;;  %p216_p4 = scmp.lt.s32.totalorder %s210_s13, %s210_s13 }
  0x2b   :  { %153 = vmatprep.subr.bf16.mxu0 %v242_v0 }
  0x2c   :  { %p217_p5 = por %p216_p4, %p215_p3 }
  0x2e   :  { %154 = vmatpush3.bf16.msra.mxu0 %v61_v6  ;;  %v51_v10 = vld [vmem:[#allocation2] sm:$0xff]  ;;  %v52_v12 = vld [vmem:[#allocation2 + $0x8] sm:$0xff]  ;;  %p218_p6 = pnand %p217_p5, %p211_p2 }
  0x31   :  { %156 = vmatmul.mubr.msk.bf16.vlgmr.msra.gmra.mrb[0].mxu0 %vm62_vm2, %v55_v9 }
 0x104   :  { %v100_v11 = vpop.f32.mrb[0].mxu0 }
 0x105   :  { %v107_v13 = vadd.f32 %v100_v11, %v51_v10  ;;  %v157_v14 = vpop.f32.mrb[1].mxu0 }
 0x106   :  { %v103_v15 = vpop.f32.mrb[2].mxu0 }
 0x107   :  { %110 = vst.msk [vmem:[#allocation2] sm:$0xff] %vm48_vm0, %v107_v13  ;;  %v108_v16 = vadd.f32 %v103_v15, %v52_v12  ;;  %v158_v17 = vpop.f32.mrb[3].mxu0 }
 0x109   :  { %111 = vst.msk [vmem:[#allocation2 + $0x8] sm:$0xff] %vm48_vm0, %v108_v16 }
 0x10e   :  { %v115_v19 = vld [vmem:[#allocation2] sm:$0xff] }
 0x10f   :  { %v124_v20 = vadd.f32 %v147_v18, %v115_v19 }
 0x110   :  { %v116_v21 = vld [vmem:[#allocation2 + $0x8] sm:$0xff] }
 0x111   :  { %v125_v22 = vadd.f32 %v147_v18, %v116_v21  ;;  %126 = vst.msk [vmem:[#allocation8] sm:$0xff] %vm48_vm0, %v124_v20 }
 0x113   :  { %127 = vst.msk [vmem:[#allocation8 + $0x8] sm:$0xff] %vm48_vm0, %v125_v22 }
 0x114   :  { %221 = shalt.err (!%p218_p6)
}
 0x115   :  { %s222_s15 = scalar_lea.hbm %s322_s3, 256 }
 0x116   :  { %p223_p7 = scmp.ne.s32.totalorder %s322_s3, %s222_s15  ;;  %p226_p8 = scmp.lt.u32.totalorder %s222_s15, %s322_s3 }
 0x118   :  { %p228_p9 = pnand %p226_p8, %p223_p7 }
 0x11a   :  { %231 = shalt.err (!%p228_p9)
}
 0x11b   :  { %139 = dma.vmem_to_hbm [thread:$0]  %s134_s12, 256, %s322_s3, [#allocation5], %s239_s22, %s239_s22, %s240_s23  }
 0x11c   :  { %236 = dma.done.wait [#allocation5], 256  }
 0x11d   :  { %237 = vsyncadd [#allocation5], 4294967040 }
 0x11e   :  { %143 = vsyncpa [#allocation4], 1 }
 0x11f   :  { %144 = vsyncpa [#allocation7], 1 }
 0x120   :  { %145 = vsyncpa [#allocation5], 1 }

</bundles_post_ra>
